<compile_context>
chip_gen: v5e
topology: v5e:2x2
jax: 0.10.0
libtpu: 0.0.40
codegen_flags: <defaults>
</compile_context>

<pallas_src>
import jax
import jax.numpy as jnp
from jax.experimental import pallas as pl
from jax.experimental.pallas import tpu as pltpu

K_SIZE = 3   # ECA kernel size (odd); taps hard-wired below for k = 3


def _eca_kernel(x_ref, w_ref, o_ref):
    # x_ref block: (TB, C, L) f32 in VMEM; w_ref: (3,) f32 in SMEM (pre-scaled by 1/L).
    C = x_ref.shape[1]

    # Global average pool over L (the 1/L factor is folded into the conv taps).
    # Read the ref for the reduction only; do NOT keep the tile live for the store.
    s = jnp.sum(x_ref[...], axis=2)                   # (TB, C), C on lanes

    # k=3 conv ACROSS the channel axis with zero padding:
    #   a[c] = w0 * s[c-1] + w1 * s[c] + w2 * s[c+1]
    col = jax.lax.broadcasted_iota(jnp.int32, s.shape, 1)
    s_m1 = jnp.where(col == 0, 0.0, pltpu.roll(s, shift=1, axis=1))          # s[c-1]
    s_p1 = jnp.where(col == C - 1, 0.0, pltpu.roll(s, shift=C - 1, axis=1))  # s[c+1]
    a = w_ref[0] * s_m1 + w_ref[1] * s + w_ref[2] * s_p1                     # (TB, C)

    # Exact sigmoid (the approx-reciprocal variant failed the accuracy check).
    gate = jax.nn.sigmoid(a)                                                 # (TB, C)

    # Re-read x_ref for the scaled store (cheap VMEM reload, avoids vreg spills).
    o_ref[...] = x_ref[...] * gate[:, :, None]


def _pick_batch_block(B, C, L, itemsize, budget_bytes=4 << 20):
    """Largest divisor of B whose (TB, C, L) block stays under the VMEM budget."""
    per_row = C * L * itemsize
    max_tb = max(1, budget_bytes // max(per_row, 1))
    tb = 1
    for cand in range(1, min(B, max_tb) + 1):
        if B % cand == 0:
            tb = cand
    return tb


def channel_eca_pallas(x, conv_w):
    """x: (B, C, L) float32; conv_w: (k,) float32 = Conv1d(1, 1, k).weight squeezed."""
    B, C, L = x.shape
    assert conv_w.shape == (K_SIZE,)
    # Fold the average pool's 1/L into the (linear, bias-free) conv taps.
    w_scaled = (conv_w / jnp.float32(L)).astype(jnp.float32)

    tb = _pick_batch_block(B, C, L, x.dtype.itemsize)
    grid = (B // tb,)
    bytes_per_elem = x.dtype.itemsize

    return pl.pallas_call(
        _eca_kernel,
        out_shape=jax.ShapeDtypeStruct((B, C, L), x.dtype),
        grid=grid,
        in_specs=[
            pl.BlockSpec((tb, C, L), lambda b: (b, 0, 0)),
            pl.BlockSpec(memory_space=pltpu.MemorySpace.SMEM),
        ],
        out_specs=pl.BlockSpec((tb, C, L), lambda b: (b, 0, 0)),
        compiler_params=pltpu.CompilerParams(
            dimension_semantics=("parallel",),
            vmem_limit_bytes=32 << 20,   # above v5e's 16 MiB scoped default, fits v7x
        ),
        cost_estimate=pl.CostEstimate(
            flops=int(3 * B * C * L),
            transcendentals=int(B * C),
            bytes_accessed=int(2 * B * C * L * bytes_per_elem),
        ),
    )(x, w_scaled)


def channel_eca_ref(x, conv_w):
    """Pure-JAX reference mirroring the PyTorch module."""
    y = jnp.mean(x, axis=-1)                          # (B, C): AdaptiveAvgPool1d(1)
    yp = jnp.pad(y, ((0, 0), (1, 1)))                 # Conv1d padding=1 over channels
    a = conv_w[0] * yp[:, :-2] + conv_w[1] * yp[:, 1:-1] + conv_w[2] * yp[:, 2:]
    gate = jax.nn.sigmoid(a)                          # (B, C)
    return x * gate[:, :, None]


if __name__ == "__main__":
    key = jax.random.PRNGKey(0)
    kx, kc, kw = jax.random.split(key, 3)
    B, C, L = 2, 64, 128
    # Add channel-dependent offsets so the per-channel gates genuinely differ.
    x = (jax.random.normal(kx, (B, C, L), jnp.float32)
         + 2.0 * jax.random.normal(kc, (B, C, 1), jnp.float32))
    conv_w = jax.random.normal(kw, (K_SIZE,), jnp.float32)

    out = jax.block_until_ready(channel_eca_pallas(x, conv_w))
    ref = jax.block_until_ready(channel_eca_ref(x, conv_w))

    assert out.shape == x.shape, (out.shape, x.shape)
    err = float(jnp.max(jnp.abs(out - ref)))
    tol = 1e-4 * (1.0 + float(jnp.max(jnp.abs(ref))))
    assert err < tol, f"max abs error {err} vs tol {tol}"
    print("KERNEL_OK")
</pallas_src>

<mosaic_0001>
module attributes {stable_mosaic.version = 11 : i64} {
  func.func @_eca_kernel(%arg0: i32, %arg1: memref<2x64x128xf32, #tpu.memory_space<vmem>>, %arg2: memref<3xf32, #tpu.memory_space<smem>>, %arg3: memref<2x64x128xf32, #tpu.memory_space<vmem>>) attributes {dimension_semantics = [#tpu.dimension_semantics<parallel>], iteration_bounds = array<i64: 1>, scalar_prefetch = 0 : i64, scratch_operands = 0 : i64, tpu.core_type = #tpu.core_type<tc>, window_params = [{transform_indices = @transform_0, window_bounds = array<i64: 2, 64, 128>}, {transform_indices = @transform_1, window_bounds = array<i64: 3>}, {transform_indices = @transform_2, window_bounds = array<i64: 2, 64, 128>}]} {
    %c0 = arith.constant 0 : index
    %c0_0 = arith.constant 0 : index
    %c0_1 = arith.constant 0 : index
    %0 = vector.load %arg1[%c0, %c0_0, %c0_1] : memref<2x64x128xf32, #tpu.memory_space<vmem>>, vector<2x64x128xf32>
    %cst = arith.constant dense<0.000000e+00> : vector<2x64xf32>
    %1 = vector.multi_reduction <add>, %0, %cst [2] : vector<2x64x128xf32> to vector<2x64xf32>
    %2 = tpu.iota {dimensions = array<i32: 1>} : vector<2x64xi32>
    %c0_i32 = arith.constant 0 : i32
    %3 = vector.broadcast %c0_i32 : i32 to vector<2x64xi32>
    %4 = arith.cmpi eq, %2, %3 : vector<2x64xi32>
    %c1_i32 = arith.constant 1 : i32
    %5 = tpu.dynamic_rotate %1 by %c1_i32 dim 1 : vector<2x64xf32>, i32 -> vector<2x64xf32>
    %cst_2 = arith.constant 0.000000e+00 : f32
    %6 = vector.broadcast %cst_2 : f32 to vector<2x64xf32>
    %7 = arith.select %4, %6, %5 : vector<2x64xi1>, vector<2x64xf32>
    %c63_i32 = arith.constant 63 : i32
    %8 = vector.broadcast %c63_i32 : i32 to vector<2x64xi32>
    %9 = arith.cmpi eq, %2, %8 : vector<2x64xi32>
    %c63_i32_3 = arith.constant 63 : i32
    %10 = tpu.dynamic_rotate %1 by %c63_i32_3 dim 1 : vector<2x64xf32>, i32 -> vector<2x64xf32>
    %cst_4 = arith.constant 0.000000e+00 : f32
    %11 = vector.broadcast %cst_4 : f32 to vector<2x64xf32>
    %12 = arith.select %9, %11, %10 : vector<2x64xi1>, vector<2x64xf32>
    %c0_5 = arith.constant 0 : index
    %13 = memref.load %arg2[%c0_5] : memref<3xf32, #tpu.memory_space<smem>>
    %14 = vector.broadcast %13 : f32 to vector<2x64xf32>
    %15 = arith.mulf %14, %7 : vector<2x64xf32>
    %c1 = arith.constant 1 : index
    %16 = memref.load %arg2[%c1] : memref<3xf32, #tpu.memory_space<smem>>
    %17 = vector.broadcast %16 : f32 to vector<2x64xf32>
    %18 = arith.mulf %17, %1 : vector<2x64xf32>
    %19 = arith.addf %15, %18 : vector<2x64xf32>
    %c2 = arith.constant 2 : index
    %20 = memref.load %arg2[%c2] : memref<3xf32, #tpu.memory_space<smem>>
    %21 = vector.broadcast %20 : f32 to vector<2x64xf32>
    %22 = arith.mulf %21, %12 : vector<2x64xf32>
    %23 = arith.addf %19, %22 : vector<2x64xf32>
    %24 = arith.negf %23 : vector<2x64xf32>
    %25 = math.exp %24 : vector<2x64xf32>
    %cst_6 = arith.constant 1.000000e+00 : f32
    %26 = vector.broadcast %cst_6 : f32 to vector<2x64xf32>
    %27 = arith.addf %26, %25 : vector<2x64xf32>
    %28 = arith.divf %26, %27 : vector<2x64xf32>
    %c0_7 = arith.constant 0 : index
    %c0_8 = arith.constant 0 : index
    %c0_9 = arith.constant 0 : index
    %29 = vector.load %arg1[%c0_7, %c0_8, %c0_9] : memref<2x64x128xf32, #tpu.memory_space<vmem>>, vector<2x64x128xf32>
    %30 = vector.shape_cast %28 : vector<2x64xf32> to vector<2x64x1xf32>
    %31 = vector.broadcast %30 : vector<2x64x1xf32> to vector<2x64x128xf32>
    %32 = arith.mulf %29, %31 : vector<2x64x128xf32>
    %c0_10 = arith.constant 0 : index
    %c0_11 = arith.constant 0 : index
    %c0_12 = arith.constant 0 : index
    %33 = vector.load %arg3[%c0_10, %c0_11, %c0_12] : memref<2x64x128xf32, #tpu.memory_space<vmem>>, vector<2x64x128xf32>
    tpu.vector_store %arg3[%c0_10, %c0_11, %c0_12], %32 {strides = array<i32>} : memref<2x64x128xf32, #tpu.memory_space<vmem>>, vector<2x64x128xf32>,
    return
  }
  func.func @transform_0(%arg0: i32) -> (i32, i32, i32) {
    %c0_i32 = arith.constant 0 : i32
    %c0_i32_0 = arith.constant 0 : i32
    %c0_i32_1 = arith.constant 0 : i32
    return %arg0, %c0_i32, %c0_i32_0 : i32, i32, i32
  }
  func.func @transform_1(%arg0: i32) -> i32 {
    %c0_i32 = arith.constant 0 : i32
    %c0_i32_0 = arith.constant 0 : i32
    return %c0_i32 : i32
  }
  func.func @transform_2(%arg0: i32) -> (i32, i32, i32) {
    %c0_i32 = arith.constant 0 : i32
    %c0_i32_0 = arith.constant 0 : i32
    %c0_i32_1 = arith.constant 0 : i32
    return %arg0, %c0_i32, %c0_i32_0 : i32, i32, i32
  }
}

</mosaic_0001>

<bundles_post_ra>
// kernel: tpu_custom_call.1
= control target key start
LH: loop header
LB: loop body
LE: loop exit
PB: predicated region body
PF: predicated region fallthrough
CT: control target
= control target key end

     0   :  { %7 = vsyncpa [#allocation3], 0  ;;  %s704_s0 = inlined_call_operand.hbm [shape: f32[2,64,128], index: 0, kind: input, shape index: {}]   ;;  %s705_s1 = inlined_call_operand.hbm [shape: f32[3], index: 1, kind: input, shape index: {}]   ;;  %s706_s2 = inlined_call_operand.hbm [shape: f32[2,64,128], index: 2, kind: output, shape index: {}]  }
   0x1   :  { %8 = vsyncpa [#allocation5], 0 }
   0x2   :  { %9 = vsyncpa [#allocation4], 0  ;;  %s14_s11 = sshll.u32 %s704_s0, 4  ;;  %s513_s12 = smov [#allocation2]   ;;  %s15_s11 = int_to_ptr.hbm [resolvable:$true] %s14_s11 }
   0x3   :  { %s16_s13 = sshll.u32 %s513_s12, 4  ;;  %s28_s16 = sshll.u32 %s705_s1, 4  ;;  %s17_s13 = int_to_ptr.vmem [resolvable:$true] %s16_s13  ;;  %s29_s16 = int_to_ptr.hbm [resolvable:$true] %s28_s16 }
   0x4   :  { %s514_s17 = smov 128   ;;  %s515_s18 = smov 8  }
   0x5   :  { %22 = dma.hbm_to_vmem [thread:$0]  %s15_s11, 2048, %s17_s13, [#allocation3], %s514_s17, %s514_s17, %s515_s18  }
   0x6   :  { %s516_s19 = smov [#allocation6]  }
   0x7   :  { %31 = dma.hbm_to_smem %s29_s16, 16, %s516_s19, [#allocation5]  }
   0x8   :  { %507 = dma.done.wait [#allocation3], 2048  }
   0x9   :  { %508 = vsyncadd [#allocation3], 4294965248 }
   0xa   :  { %509 = dma.done.wait [#allocation5], 16  }
   0xb   :  { %510 = vsyncadd [#allocation5], 4294967280 }
   0xc   :  { %40 = sfence }
   0xd   :  { %v545_v0 = vld [vmem:[#allocation2 + $0x40] sm:$0xff]  ;;  %v549_v2 = vld [vmem:[#allocation2 + $0x10] sm:$0xff]  ;;  %v554_v3 = vld [vmem:[#allocation2 + $0x48] sm:$0xff]  ;;  %s415_s0 = sld [smem:[#allocation6 + $0x1]]  ;;  %v89_v16 = vlaneseq  ;;  %vm111_vm0 = vcmask 130112   ;;  %vm115_vm1 = vcmask 195712  }
   0xe   :  { %v547_v1 = vld [vmem:[#allocation2] sm:$0xff]  ;;  %73 = vadd.xlane.f32.xlu1 %v545_v0  ;;  %61 = vadd.xlane.f32.xlu2 %v549_v2  ;;  %v556_v4 = vld [vmem:[#allocation2 + $0x8] sm:$0xff]  ;;  %v558_v5 = vld [vmem:[#allocation2 + $0x50] sm:$0xff]  ;;  %vm119_vm2 = vcmask 261312   ;;  %vm123_vm3 = vcmask 326912   ;;  %vm127_vm4 = vcmask 392512  }
   0xf   :  { %57 = vadd.xlane.f32.xlu0 %v547_v1  ;;  %v563_v6 = vld [vmem:[#allocation2 + $0x58] sm:$0xff]  ;;  %v567_v8 = vld [vmem:[#allocation2 + $0x20] sm:$0xff]  ;;  %v572_v9 = vld [vmem:[#allocation2 + $0x28] sm:$0xff]  ;;  %v594_v17 = vand.u32 127, %v89_v16  ;;  %vm131_vm5 = vcmask 458112   ;;  %vm135_vm6 = vcmask 523712  }
  0x10   :  { %v565_v7 = vld [vmem:[#allocation2 + $0x18] sm:$0xff]  ;;  %v574_v10 = vld [vmem:[#allocation2 + $0x60] sm:$0xff]  ;;  %v576_v11 = vld [vmem:[#allocation2 + $0x68] sm:$0xff]  ;;  %vm152_vm7 = vcmask 1041409   ;;  %s517_s1 = smov 64   ;;  %vm155_vm8 = vcmask 1048064  }
  0x11   :  { %v581_v12 = vld [vmem:[#allocation2 + $0x70] sm:$0xff]  ;;  %v585_v14 = vld [vmem:[#allocation2 + $0x38] sm:$0xff]  ;;  %v605_v22 = vadd.s32 4294967280, %v594_v17  ;;  %v109_v30 = vadd.s32 4294967288, %v594_v17  ;;  %v117_v45 = vadd.s32 4294967272, %v594_v17  ;;  %v121_v49 = vadd.s32 4294967264, %v594_v17 }
  0x12   :  { %v583_v13 = vld [vmem:[#allocation2 + $0x30] sm:$0xff]  ;;  %v590_v15 = vld [vmem:[#allocation2 + $0x78] sm:$0xff]  ;;  %v125_v59 = vadd.s32 4294967256, %v594_v17  ;;  %s518_s20 = smov 127   ;;  %s519_s21 = smov 65   ;;  %vm167_vm9 = vcmp.eq.s32.totalorder %v594_v17, 63 }
  0x13   :  { %v600_v20 = vstv %s415_s0  ;;  %s172_s22 = sld [smem:[#allocation6]]  ;;  %vm91_vm10 = vcmp.eq.s32.totalorder %v594_v17, 0  ;;  %s520_s24 = smov [#allocation7]  }
  0x14   :  { %s416_s23 = sld [smem:[#allocation6 + $0x2]]  ;;  %s399_s25 = sshll.u32 %s520_s24, 4  ;;  %s400_s25 = int_to_ptr.vmem [resolvable:$true] %s399_s25 }
  0x15   :  { %s401_s28 = sshll.u32 %s706_s2, 4  ;;  %s402_s28 = int_to_ptr.hbm [resolvable:$true] %s401_s28 }
  0x16   :  { %75 = vadd.xlane.f32.xlu1 %v554_v3  ;;  %77 = vadd.xlane.f32.xlu2 %v558_v5 }
  0x17   :  { %59 = vadd.xlane.f32.xlu0 %v556_v4 }
  0x1e   :  { %79 = vadd.xlane.f32.xlu1 %v563_v6  ;;  %65 = vadd.xlane.f32.xlu2 %v567_v8 }
  0x1f   :  { %63 = vadd.xlane.f32.xlu0 %v565_v7 }
  0x26   :  { %67 = vadd.xlane.f32.xlu1 %v572_v9  ;;  %83 = vadd.xlane.f32.xlu2 %v576_v11 }
  0x27   :  { %81 = vadd.xlane.f32.xlu0 %v574_v10 }
  0x2e   :  { %85 = vadd.xlane.f32.xlu1 %v581_v12  ;;  %71 = vadd.xlane.f32.xlu2 %v585_v14 }
  0x2f   :  { %69 = vadd.xlane.f32.xlu0 %v583_v13 }
  0x37   :  { %87 = vadd.xlane.f32.xlu0 %v590_v15 }
  0x81   :  { %v596_v18 = vpop.xlane.xlu1 %73  ;;  %v602_v21 = vpop.xlane.xlu2 %61 }
  0x82   :  { %v598_v19 = vpop.xlane.xlu0 %57  ;;  %v179_v23 = vmul.f32 %v600_v20, %v602_v21  ;;  %v185_v25 = vmul.f32 %v600_v20, %v596_v18 }
  0x83   :  { %v177_v26 = vmul.f32 %v600_v20, %v598_v19 }
  0x84   :  { %v212_v24 = vperm.slane %v179_v23, %v605_v22  ;;  %v224_v29 = vperm.slane %v185_v25, %v594_v17 }
  0x85   :  { %v209_v35 = vperm.slane %v177_v26, %v594_v17  ;;  %v137_v26 = vperm.slane %v596_v18, %v594_v17 }
  0x89   :  { %v614_v27 = vpop.xlane.xlu1 %75  ;;  %v621_v33 = vpop.xlane.xlu2 %77 }
  0x8a   :  { %v60_v28 = vpop.xlane.xlu0 %59  ;;  %v186_v31 = vmul.f32 %v600_v20, %v614_v27  ;;  %v187_v34 = vmul.f32 %v600_v20, %v621_v33  ;;  %v140_v18 = vperm.slane %v621_v33, %v605_v22 }
  0x8b   :  { %v178_v32 = vmul.f32 %v600_v20, %v60_v28  ;;  %v110_v23 = vperm.slane %v60_v28, %v109_v30 }
  0x8c   :  { %v225_v36 = vperm.slane %v186_v31, %v109_v30  ;;  %v227_v38 = vperm.slane %v187_v34, %v605_v22  ;;  %v108_v31 = vperm.slane %v598_v19, %v594_v17 }
  0x8d   :  { %v210_v37 = vperm.slane %v178_v32, %v109_v30  ;;  %v138_v32 = vperm.slane %v614_v27, %v109_v30  ;;  %v133_v30 = vadd.s32 4294967240, %v594_v17 }
  0x8e   :  { %v226_v39 = vsel %vm111_vm0, %v225_v36, %v224_v29  ;;  %v114_v36 = vperm.slane %v602_v21, %v605_v22 }
  0x8f   :  { %v211_v40 = vsel %vm111_vm0, %v210_v37, %v209_v35  ;;  %v228_v41 = vsel %vm115_vm1, %v227_v38, %v226_v39  ;;  %v112_v37 = vsel %vm111_vm0, %v110_v23, %v108_v31  ;;  %v129_v39 = vadd.s32 4294967248, %v594_v17 }
  0x90   :  { %v213_v42 = vsel %vm115_vm1, %v212_v24, %v211_v40  ;;  %v139_v40 = vsel %vm111_vm0, %v138_v32, %v137_v26 }
  0x91   :  { %v80_v43 = vpop.xlane.xlu1 %79  ;;  %v66_v48 = vpop.xlane.xlu2 %65 }
  0x92   :  { %v64_v44 = vpop.xlane.xlu0 %63  ;;  %v188_v46 = vmul.f32 %v600_v20, %v80_v43  ;;  %v181_v50 = vmul.f32 %v600_v20, %v66_v48 }
  0x93   :  { %v180_v47 = vmul.f32 %v600_v20, %v64_v44  ;;  %v118_v38 = vperm.slane %v64_v44, %v117_v45  ;;  %v116_v44 = vsel %vm115_vm1, %v114_v36, %v112_v37 }
  0x94   :  { %v229_v51 = vperm.slane %v188_v46, %v117_v45  ;;  %v216_v53 = vperm.slane %v181_v50, %v121_v49 }
  0x95   :  { %v214_v52 = vperm.slane %v180_v47, %v117_v45  ;;  %v122_v47 = vperm.slane %v66_v48, %v121_v49  ;;  %v120_v33 = vsel %vm119_vm2, %v118_v38, %v116_v44 }
  0x96   :  { %v230_v54 = vsel %vm119_vm2, %v229_v51, %v228_v41  ;;  %v142_v41 = vperm.slane %v80_v43, %v117_v45 }
  0x97   :  { %v215_v55 = vsel %vm119_vm2, %v214_v52, %v213_v42 }
  0x98   :  { %v217_v56 = vsel %vm123_vm3, %v216_v53, %v215_v55 }
  0x99   :  { %v68_v57 = vpop.xlane.xlu1 %67  ;;  %v84_v62 = vpop.xlane.xlu2 %83 }
  0x9a   :  { %v82_v58 = vpop.xlane.xlu0 %81  ;;  %v182_v60 = vmul.f32 %v600_v20, %v68_v57  ;;  %v190_v63 = vmul.f32 %v600_v20, %v84_v62  ;;  %v126_v51 = vperm.slane %v68_v57, %v125_v59 }
  0x9b   :  { %v189_v61 = vmul.f32 %v600_v20, %v82_v58  ;;  %v144_v50 = vperm.slane %v82_v58, %v121_v49 }
  0x9c   :  { %v218_v24 = vperm.slane %v182_v60, %v125_v59  ;;  %v233_v29 = vperm.slane %v190_v63, %v125_v59 }
  0x9d   :  { %v231_v25 = vperm.slane %v189_v61, %v121_v49  ;;  %v124_v49 = vsel %vm123_vm3, %v122_v47, %v120_v33 }
  0x9e   :  { %v219_v34 = vsel %vm127_vm4, %v218_v24, %v217_v56  ;;  %v146_v56 = vperm.slane %v84_v62, %v125_v59  ;;  %v128_v63 = vsel %vm127_vm4, %v126_v51, %v124_v49 }
  0x9f   :  { %v232_v35 = vsel %vm123_vm3, %v231_v25, %v230_v54  ;;  %v141_v54 = vsel %vm115_vm1, %v140_v18, %v139_v40  ;;  %v173_v40 = vstv %s172_s22 }
  0xa0   :  { %v234_v28 = vsel %vm127_vm4, %v233_v29, %v232_v35  ;;  %v143_v45 = vsel %vm119_vm2, %v142_v41, %v141_v54 }
  0xa1   :  { %v86_v19 = vpop.xlane.xlu1 %85  ;;  %v72_v46 = vpop.xlane.xlu2 %71  ;;  %v145_v58 = vsel %vm123_vm3, %v144_v50, %v143_v45 }
  0xa2   :  { %v70_v27 = vpop.xlane.xlu0 %69  ;;  %v191_v21 = vmul.f32 %v600_v20, %v86_v19  ;;  %v184_v22 = vmul.f32 %v600_v20, %v72_v46  ;;  %v148_v61 = vperm.slane %v86_v19, %v129_v39  ;;  %v134_v23 = vperm.slane %v72_v46, %v133_v30 }
  0xa3   :  { %v183_v42 = vmul.f32 %v600_v20, %v70_v27  ;;  %v130_v55 = vperm.slane %v70_v27, %v129_v39  ;;  %v147_v26 = vsel %vm127_vm4, %v146_v56, %v145_v58 }
  0xa4   :  { %v235_v52 = vperm.slane %v191_v21, %v129_v39  ;;  %v222_v43 = vperm.slane %v184_v22, %v133_v30  ;;  %v149_v29 = vsel %vm131_vm5, %v148_v61, %v147_v26  ;;  %v243_v21 = vstv %s416_s23 }
  0xa5   :  { %v220_v53 = vperm.slane %v183_v42, %v129_v39  ;;  %v132_v25 = vsel %vm131_vm5, %v130_v55, %v128_v63  ;;  %v267_v39 = vshrl.u32 %v89_v16, 7 }
  0xa6   :  { %v236_v60 = vsel %vm131_vm5, %v235_v52, %v234_v28  ;;  %v136_v32 = vsel %vm135_vm6, %v134_v23, %v132_v25 }
  0xa7   :  { %v221_v48 = vsel %vm131_vm5, %v220_v53, %v219_v34  ;;  %426 = vset.pattern.permute.xlu1 %v267_v39  ;;  %v280_v19 = vadd.s32 16, %v267_v39  ;;  %v274_v27 = vadd.s32 8, %v267_v39  ;;  %v292_v58 = vadd.s32 32, %v267_v39 }
  0xa8   :  { %v223_v57 = vsel %vm135_vm6, %v222_v43, %v221_v48  ;;  %v304_v61 = vadd.s32 48, %v267_v39  ;;  %v310_v63 = vadd.s32 56, %v267_v39  ;;  %v298_v23 = vadd.s32 40, %v267_v39 }
  0xa9   :  { %428 = vset.pattern.permute.xlu2 %v280_v19  ;;  %427 = vset.pattern.permute.xlu0 %v274_v27 }
  0xaa   :  { %v88_v24 = vpop.xlane.xlu0 %87 }
  0xab   :  { %v150_v59 = vperm.slane %v88_v24, %v133_v30  ;;  %v192_v62 = vmul.f32 %v600_v20, %v88_v24 }
  0xad   :  { %v237_v31 = vperm.slane %v192_v62, %v133_v30  ;;  %v151_v34 = vsel %vm135_vm6, %v150_v59, %v149_v29 }
  0xae   :  { %v153_v35 = vsel %vm152_vm7, %v151_v34, %v136_v32 }
  0xaf   :  { %156 = vrot.lane.b32.xlu1 %v153_v35, %s517_s1  ;;  %v238_v36 = vsel %vm135_vm6, %v237_v31, %v236_v60 }
  0xb0   :  { %v239_v28 = vsel %vm152_vm7, %v238_v36, %v223_v57  ;;  %v286_v57 = vadd.s32 24, %v267_v39 }
 0x121   :  { %v157_v37 = vpop.permute.xlu1 %156 }
 0x122   :  { %v158_v38 = vsel %vm155_vm8, %v157_v37, %v153_v35 }
 0x123   :  { %159 = vrot.lane.b32.xlu2 %v158_v38, %s517_s1 }
 0x17d   :  { %v160_v18 = vpop.permute.xlu2 %159 }
 0x17e   :  { %v161_v20 = vsel %vm155_vm8, %v160_v18, %v153_v35 }
 0x17f   :  { %168 = vrot.lane.b32.xlu2 %v161_v20, %s518_s20  ;;  %163 = vrot.lane.b32.xlu0 %v161_v20, %s519_s21 }
 0x1d9   :  { %v169_v30 = vpop.permute.xlu2 %168 }
 0x1da   :  { %v171_v42 = vsel %vm167_vm9, 0.0, %v169_v30 }
 0x1db   :  { %v244_v47 = vmul.f32 %v243_v21, %v171_v42 }
 0x1f1   :  { %v164_v41 = vpop.permute.xlu0 %163 }
 0x1f2   :  { %v166_v46 = vsel %vm91_vm10, 0.0, %v164_v41 }
 0x1f3   :  { %v174_v44 = vmul.f32 %v173_v40, %v166_v46 }
 0x1f5   :  { %v241_v50 = vadd.f32 %v239_v28, %v174_v44 }
 0x1f7   :  { %v245_v22 = vadd.f32 %v244_v47, %v241_v50 }
 0x1f9   :  { %v417_v16 = vmul.f32 -1.442695, %v245_v22 }
 0x1fb   :  { %443 = vpow2.f32 %v417_v16 }
 0x201   :  { %v444_v33 = vpop.eup %443 }
 0x202   :  { %v249_v51 = vadd.f32 1.0, %v444_v33 }
 0x204   :  { %445 = vrcp.f32 %v249_v51  ;;  %v261_v17 = vand.u32 2147483648, %v249_v51  ;;  %v259_v43 = vand.u32 2147483647, %v249_v51  ;;  %vm255_vm12 = vweird.f32 %v249_v51 }
 0x206   :  { %v262_v56 = vor.u32 1.1754944e-38, %v261_v17  ;;  %vm260_vm14 = vcmp.eq.f32.partialorder %v259_v43, 8.507059e+37 }
 0x20a   :  { %v446_v52 = vpop.eup %445 }
 0x20b   :  { %v251_v53 = vmul.f32 %v446_v52, %v249_v51  ;;  %vm256_vm11 = vweird.f32 %v446_v52 }
 0x20c   :  { %vm257_vm13 = vmor %vm255_vm12, %vm256_vm11 }
 0x20d   :  { %v252_v54 = vsub.f32 1.0, %v251_v53 }
 0x20f   :  { %v253_v55 = vmul.f32 %v446_v52, %v252_v54 }
 0x211   :  { %v254_v45 = vadd.f32 %v446_v52, %v253_v55 }
 0x213   :  { %v258_v60 = vsel %vm257_vm13, %v446_v52, %v254_v45 }
 0x214   :  { %v263_v48 = vsel %vm260_vm14, %v262_v56, %v258_v60 }
 0x215   :  { %v265_v49 = vperm.slane %v263_v48, 0  ;;  %v314_v24 = vperm.slane %v263_v48, 1 }
 0x217   :  { %282 = vperm.xlu2 %428, %v265_v49   ;;  %276 = vperm.xlu0 %427, %v265_v49  }
 0x218   :  { %270 = vperm.xlu1 %426, %v265_v49  }
 0x21f   :  { %430 = vset.pattern.permute.xlu2 %v292_v58  ;;  %432 = vset.pattern.permute.xlu0 %v304_v61 }
 0x220   :  { %429 = vset.pattern.permute.xlu1 %v286_v57 }
 0x227   :  { %294 = vperm.xlu2 %430, %v265_v49   ;;  %306 = vperm.xlu0 %432, %v265_v49  }
 0x228   :  { %288 = vperm.xlu1 %429, %v265_v49  }
 0x22f   :  { %433 = vset.pattern.permute.xlu2 %v310_v63  ;;  %437 = vset.pattern.permute.xlu0 %v286_v57 }
 0x230   :  { %431 = vset.pattern.permute.xlu1 %v298_v23 }
 0x237   :  { %312 = vperm.xlu2 %433, %v265_v49   ;;  %337 = vperm.xlu0 %437, %v314_v24  }
 0x238   :  { %300 = vperm.xlu1 %431, %v265_v49  }
 0x23f   :  { %435 = vset.pattern.permute.xlu2 %v274_v27  ;;  %442 = vset.pattern.permute.xlu0 %v310_v63 }
 0x240   :  { %434 = vset.pattern.permute.xlu1 %v267_v39 }
 0x247   :  { %325 = vperm.xlu2 %435, %v314_v24  }
 0x248   :  { %319 = vperm.xlu1 %434, %v314_v24  }
 0x24f   :  { %438 = vset.pattern.permute.xlu2 %v292_v58 }
 0x250   :  { %436 = vset.pattern.permute.xlu1 %v280_v19 }
 0x257   :  { %343 = vperm.xlu2 %438, %v314_v24  }
 0x258   :  { %331 = vperm.xlu1 %436, %v314_v24  }
 0x25f   :  { %440 = vset.pattern.permute.xlu2 %v304_v61 }
 0x260   :  { %439 = vset.pattern.permute.xlu1 %v298_v23 }
 0x267   :  { %355 = vperm.xlu2 %440, %v314_v24  }
 0x268   :  { %349 = vperm.xlu1 %439, %v314_v24  }
 0x270   :  { %441 = vset.pattern.permute.xlu1 %v310_v63 }
 0x271   :  { %v283_v25 = vpop.permute.xlu2 %282 }
 0x272   :  { %v365_v26 = vmul.f32 %v283_v25, %v549_v2 }
 0x274   :  { %381 = vst [vmem:[#allocation7 + $0x10] sm:$0xff] %v365_v26 }
 0x278   :  { %361 = vperm.xlu1 %441, %v314_v24  }
 0x281   :  { %v295_v59 = vpop.permute.xlu2 %294 }
 0x282   :  { %v367_v62 = vmul.f32 %v295_v59, %v567_v8 }
 0x284   :  { %383 = vst [vmem:[#allocation7 + $0x20] sm:$0xff] %v367_v62 }
 0x289   :  { %v277_v29 = vpop.permute.xlu0 %276 }
 0x28a   :  { %v364_v31 = vmul.f32 %v277_v29, %v556_v4  ;;  %v271_v32 = vpop.permute.xlu1 %270 }
 0x28b   :  { %v363_v34 = vmul.f32 %v271_v32, %v547_v1 }
 0x28c   :  { %380 = vst [vmem:[#allocation7 + $0x8] sm:$0xff] %v364_v31 }
 0x28d   :  { %379 = vst [vmem:[#allocation7] sm:$0xff] %v363_v34 }
 0x291   :  { %v313_v35 = vpop.permute.xlu2 %312 }
 0x292   :  { %v370_v36 = vmul.f32 %v313_v35, %v585_v14 }
 0x294   :  { %386 = vst [vmem:[#allocation7 + $0x38] sm:$0xff] %v370_v36 }
 0x299   :  { %v307_v28 = vpop.permute.xlu0 %306 }
 0x29a   :  { %v369_v2 = vmul.f32 %v307_v28, %v583_v13  ;;  %v289_v37 = vpop.permute.xlu1 %288 }
 0x29b   :  { %v366_v38 = vmul.f32 %v289_v37, %v565_v7 }
 0x29c   :  { %385 = vst [vmem:[#allocation7 + $0x30] sm:$0xff] %v369_v2 }
 0x29d   :  { %382 = vst [vmem:[#allocation7 + $0x18] sm:$0xff] %v366_v38 }
 0x2a1   :  { %v326_v8 = vpop.permute.xlu2 %325 }
 0x2a2   :  { %v372_v4 = vmul.f32 %v326_v8, %v554_v3 }
 0x2a4   :  { %388 = vst [vmem:[#allocation7 + $0x48] sm:$0xff] %v372_v4 }
 0x2a9   :  { %v338_v18 = vpop.permute.xlu0 %337 }
 0x2aa   :  { %v374_v1 = vmul.f32 %v338_v18, %v563_v6  ;;  %v301_v20 = vpop.permute.xlu1 %300 }
 0x2ab   :  { %v368_v39 = vmul.f32 %v301_v20, %v572_v9 }
 0x2ac   :  { %390 = vst [vmem:[#allocation7 + $0x58] sm:$0xff] %v374_v1 }
 0x2ad   :  { %384 = vst [vmem:[#allocation7 + $0x28] sm:$0xff] %v368_v39 }
 0x2b1   :  { %v344_v14 = vpop.permute.xlu2 %343 }
 0x2b2   :  { %v375_v13 = vmul.f32 %v344_v14, %v574_v10 }
 0x2b4   :  { %391 = vst [vmem:[#allocation7 + $0x60] sm:$0xff] %v375_v13 }
 0x2ba   :  { %v320_v19 = vpop.permute.xlu1 %319 }
 0x2bb   :  { %v371_v7 = vmul.f32 %v320_v19, %v545_v0 }
 0x2bd   :  { %387 = vst [vmem:[#allocation7 + $0x40] sm:$0xff] %v371_v7 }
 0x2c1   :  { %v356_v27 = vpop.permute.xlu2 %355 }
 0x2c2   :  { %v377_v3 = vmul.f32 %v356_v27, %v581_v12 }
 0x2c4   :  { %393 = vst [vmem:[#allocation7 + $0x70] sm:$0xff] %v377_v3 }
 0x2ca   :  { %v332_v30 = vpop.permute.xlu1 %331 }
 0x2cb   :  { %v373_v6 = vmul.f32 %v332_v30, %v558_v5 }
 0x2cd   :  { %389 = vst [vmem:[#allocation7 + $0x50] sm:$0xff] %v373_v6 }
 0x2da   :  { %v350_v40 = vpop.permute.xlu1 %349 }
 0x2db   :  { %v376_v9 = vmul.f32 %v350_v40, %v576_v11 }
 0x2dd   :  { %392 = vst [vmem:[#allocation7 + $0x68] sm:$0xff] %v376_v9 }
 0x2ea   :  { %v362_v0 = vpop.permute.xlu1 %361 }
 0x2eb   :  { %v378_v10 = vmul.f32 %v362_v0, %v590_v15 }
 0x2ed   :  { %394 = vst [vmem:[#allocation7 + $0x78] sm:$0xff] %v378_v10 }
 0x2ee   :  { %407 = dma.vmem_to_hbm [thread:$0]  %s400_s25, 2048, %s402_s28, [#allocation4], %s514_s17, %s514_s17, %s515_s18  }
 0x2ef   :  { %511 = dma.done.wait [#allocation4], 2048  }
 0x2f0   :  { %512 = vsyncadd [#allocation4], 4294965248 }
 0x2f1   :  { %412 = vsyncpa [#allocation3], 1 }
 0x2f2   :  { %413 = vsyncpa [#allocation4], 1 }
 0x2f3   :  { %414 = vsyncpa [#allocation5], 1 }

</bundles_post_ra>
